<compile_context>
chip_gen: v7x
topology: tpu7x:2x2x1
jax: 0.10.0
libtpu: 0.0.40
codegen_flags: <defaults>
</compile_context>

<pallas_src>
import functools

import jax
import jax.numpy as jnp
from jax import lax
from jax.experimental import pallas as pl
from jax.experimental.pallas import tpu as pltpu


_LANES = 512           # lane-dense last dim of the flattened view (multiple of 128)
_MAX_TILE_ROWS = 2048  # 2048 x 512 x 4B = 4 MiB per f32 block


# ----------------------------- Pallas kernel ---------------------------------

def _dropout_kernel(seed_ref, x_ref, o_ref, *, keep_threshold_24, scale, tile_rows):
    """Inverted dropout on one [tile_rows, C] tile.

    seed_ref : SMEM scalar-prefetch ref, int32[1]
    x_ref    : VMEM tile of the (flattened, lane-dense) input
    o_ref    : VMEM tile of the output
    """
    tm, tc = x_ref.shape
    pid = pl.program_id(0)

    # Global flat element index for every element of this tile (uint32 counter).
    # Independent of the tiling, so the mask is deterministic per (seed, index).
    row = lax.broadcasted_iota(jnp.int32, (tm, tc), 0).astype(jnp.uint32)
    col = lax.broadcasted_iota(jnp.int32, (tm, tc), 1).astype(jnp.uint32)
    base_row = (pid * tile_rows).astype(jnp.uint32)
    idx = (base_row + row) * jnp.uint32(tc) + col

    # Counter-based hash: seed mixed via golden-ratio multiply, then the
    # "lowbias32" avalanche finalizer.  Pure VPU integer ops (portable).
    seed = seed_ref[0].astype(jnp.uint32)
    h = idx ^ (seed * jnp.uint32(0x9E3779B9))
    h = (h ^ (h >> 16)) * jnp.uint32(0x7FEB352D)
    h = (h ^ (h >> 15)) * jnp.uint32(0x846CA68B)
    h = h ^ (h >> 16)

    # Integer-domain keep test on the top 24 bits:  P(keep) = 1 - p.
    r24 = (h >> 8).astype(jnp.int32)
    keep = r24 >= keep_threshold_24

    x = x_ref[...]
    # `scale` is a weakly-typed Python float -> compute stays in x.dtype.
    o_ref[...] = jnp.where(keep, x * scale, 0.0).astype(o_ref.dtype)


# ------------------------- jitted forward (train path) ------------------------

@functools.partial(jax.jit, static_argnames=("keep_threshold_24", "scale"))
def _dropout_apply(x, seed_arr, *, keep_threshold_24, scale):
    orig_shape = x.shape
    n = x.size
    c = _LANES

    # Flatten to a lane-dense 2D view [m_pad, 512] and tile rows.
    m = -(-n // c)
    tile_rows = m if m <= _MAX_TILE_ROWS else _MAX_TILE_ROWS
    grid = -(-m // tile_rows)
    m_pad = grid * tile_rows
    n_pad = m_pad * c

    flat = x.reshape(-1)
    if n_pad != n:
        flat = jnp.pad(flat, (0, n_pad - n))
    x2d = flat.reshape(m_pad, c)

    kernel = functools.partial(
        _dropout_kernel,
        keep_threshold_24=keep_threshold_24,
        scale=scale,
        tile_rows=tile_rows,
    )

    out2d = pl.pallas_call(
        kernel,
        out_shape=jax.ShapeDtypeStruct((m_pad, c), x.dtype),
        grid_spec=pltpu.PrefetchScalarGridSpec(
            num_scalar_prefetch=1,
            grid=(grid,),
            in_specs=[pl.BlockSpec((tile_rows, c), lambda i, seed_ref: (i, 0))],
            out_specs=pl.BlockSpec((tile_rows, c), lambda i, seed_ref: (i, 0)),
        ),
        compiler_params=pltpu.CompilerParams(
            # Row axis is independent work -> shard across TCs on v7x.
            dimension_semantics=("parallel",),
            # 2 in-bufs + 2 out-bufs @ <= 4 MiB each, plus headroom.
            vmem_limit_bytes=32 << 20,
        ),
    )(seed_arr, x2d)

    out = out2d.reshape(-1)
    if n_pad != n:
        out = out[:n]
    return out.reshape(orig_shape)


# ------------------------------ Python wrapper --------------------------------

class PositionalEncoding:
    """JAX/Pallas port of the PyTorch PositionalEncoding module.

    forward(x) == dropout(x).  The `pe`/`position`/`div_term` tensors from the
    reference __init__ are dead locals (never registered, never used), so they
    are not materialized here.
    """

    def __init__(self, d_model, dropout, max_len=65536):
        self.d_model = d_model
        self.max_len = max_len
        self.p = float(dropout)
        # TODO(synk): the reference __init__ builds (and discards) a PE table;
        # it never reaches forward(), so it is intentionally not built.

    def __call__(self, x, *, seed=0, train=True):
        # Eval mode / p == 0: dropout is the identity -> skip the kernel
        # entirely (saves a full read+write HBM pass).
        if (not train) or self.p <= 0.0:
            return x
        if self.p >= 1.0:
            return jnp.zeros_like(x)

        seed_arr = jnp.asarray([seed], dtype=jnp.int32)
        return _dropout_apply(
            x,
            seed_arr,
            keep_threshold_24=int(round(self.p * (1 << 24))),
            scale=1.0 / (1.0 - self.p),
        )


# ---------------------------------- main --------------------------------------

if __name__ == "__main__":
    key = jax.random.PRNGKey(0)

    seq_len, batch, d_model = 8, 2, 32
    p_drop = 0.1

    x = jax.random.normal(key, (seq_len, batch, d_model), dtype=jnp.float32)

    module = PositionalEncoding(d_model=d_model, dropout=p_drop, max_len=128)

    # Train mode: dropout applied with the in-kernel counter-based PRNG.
    y_train = jax.block_until_ready(module(x, seed=1234, train=True))

    # Eval mode: dropout is the identity (kernel skipped).
    y_eval = jax.block_until_ready(module(x, seed=1234, train=False))

    assert y_train.shape == x.shape and y_train.dtype == x.dtype
    assert jnp.array_equal(y_eval, x), "eval-mode dropout must be identity"

    # Determinism: same seed -> same mask.
    y_train2 = jax.block_until_ready(module(x, seed=1234, train=True))
    assert jnp.array_equal(y_train, y_train2), "same seed must give same mask"

    # Sanity: surviving elements are exactly x * (1 / (1 - p)).
    kept = y_train != 0.0
    expected = x * (1.0 / (1.0 - p_drop))
    ratio_ok = jnp.allclose(
        jnp.where(kept, y_train, 0.0),
        jnp.where(kept, expected, 0.0),
        rtol=1e-6, atol=1e-6,
    )
    assert bool(ratio_ok), "kept elements must be scaled by 1/(1-p)"

    # Sanity: keep rate roughly (1 - p); some elements actually dropped.
    keep_rate = float(jnp.mean(kept.astype(jnp.float32)))
    assert 0.75 <= keep_rate < 1.0, f"unexpected keep rate {keep_rate}"

    print("KERNEL_OK")
</pallas_src>

<mosaic_0001>
module attributes {stable_mosaic.version = 11 : i64} {
  func.func @_dropout_kernel(%arg0: i32, %arg1: memref<1xi32, #tpu.memory_space<smem>>, %arg2: memref<1x512xf32, #tpu.memory_space<vmem>>, %arg3: memref<1x512xf32, #tpu.memory_space<vmem>>) attributes {dimension_semantics = [#tpu.dimension_semantics<parallel>], iteration_bounds = array<i64: 1>, scalar_prefetch = 1 : i64, scratch_operands = 0 : i64, tpu.core_type = #tpu.core_type<tc>, window_params = [{transform_indices = @transform_0, window_bounds = array<i64: 1, 512>}, {transform_indices = @transform_1, window_bounds = array<i64: 1, 512>}]} {
    %0 = tpu.iota {dimensions = array<i32: 0>} : vector<1x512xi32>
    %1 = tpu.iota {dimensions = array<i32: 1>} : vector<1x512xi32>
    %c1_i32 = arith.constant 1 : i32
    %2 = arith.muli %arg0, %c1_i32 : i32
    %3 = vector.broadcast %2 : i32 to vector<1x512xi32>
    %4 = arith.addi %3, %0 : vector<1x512xi32>
    %c512_i32 = arith.constant 512 : i32
    %5 = vector.broadcast %c512_i32 : i32 to vector<1x512xi32>
    %6 = arith.muli %4, %5 : vector<1x512xi32>
    %7 = arith.addi %6, %1 : vector<1x512xi32>
    %c0 = arith.constant 0 : index
    %8 = memref.load %arg1[%c0] : memref<1xi32, #tpu.memory_space<smem>>
    %c-1640531527_i32 = arith.constant -1640531527 : i32
    %9 = arith.muli %8, %c-1640531527_i32 : i32
    %10 = vector.broadcast %9 : i32 to vector<1x512xi32>
    %11 = arith.xori %7, %10 : vector<1x512xi32>
    %c16_i32 = arith.constant 16 : i32
    %12 = vector.broadcast %c16_i32 : i32 to vector<1x512xi32>
    %13 = arith.shrui %11, %12 : vector<1x512xi32>
    %14 = arith.xori %11, %13 : vector<1x512xi32>
    %c2146121005_i32 = arith.constant 2146121005 : i32
    %15 = vector.broadcast %c2146121005_i32 : i32 to vector<1x512xi32>
    %16 = arith.muli %14, %15 : vector<1x512xi32>
    %c15_i32 = arith.constant 15 : i32
    %17 = vector.broadcast %c15_i32 : i32 to vector<1x512xi32>
    %18 = arith.shrui %16, %17 : vector<1x512xi32>
    %19 = arith.xori %16, %18 : vector<1x512xi32>
    %c-2073254261_i32 = arith.constant -2073254261 : i32
    %20 = vector.broadcast %c-2073254261_i32 : i32 to vector<1x512xi32>
    %21 = arith.muli %19, %20 : vector<1x512xi32>
    %c16_i32_0 = arith.constant 16 : i32
    %22 = vector.broadcast %c16_i32_0 : i32 to vector<1x512xi32>
    %23 = arith.shrui %21, %22 : vector<1x512xi32>
    %24 = arith.xori %21, %23 : vector<1x512xi32>
    %c8_i32 = arith.constant 8 : i32
    %25 = vector.broadcast %c8_i32 : i32 to vector<1x512xi32>
    %26 = arith.shrui %24, %25 : vector<1x512xi32>
    %c1677722_i32 = arith.constant 1677722 : i32
    %27 = vector.broadcast %c1677722_i32 : i32 to vector<1x512xi32>
    %28 = arith.cmpi sge, %26, %27 : vector<1x512xi32>
    %c0_1 = arith.constant 0 : index
    %c0_2 = arith.constant 0 : index
    %29 = vector.load %arg2[%c0_1, %c0_2] : memref<1x512xf32, #tpu.memory_space<vmem>>, vector<1x512xf32>
    %cst = arith.constant 1.11111116 : f32
    %30 = vector.broadcast %cst : f32 to vector<1x512xf32>
    %31 = arith.mulf %29, %30 : vector<1x512xf32>
    %cst_3 = arith.constant 0.000000e+00 : f32
    %32 = vector.broadcast %cst_3 : f32 to vector<1x512xf32>
    %33 = arith.select %28, %31, %32 : vector<1x512xi1>, vector<1x512xf32>
    %c0_4 = arith.constant 0 : index
    %c0_5 = arith.constant 0 : index
    %34 = vector.load %arg3[%c0_4, %c0_5] : memref<1x512xf32, #tpu.memory_space<vmem>>, vector<1x512xf32>
    tpu.vector_store %arg3[%c0_4, %c0_5], %33 {strides = array<i32>} : memref<1x512xf32, #tpu.memory_space<vmem>>, vector<1x512xf32>,
    return
  }
  func.func @transform_0(%arg0: i32, %arg1: memref<1xi32, #tpu.memory_space<smem>>) -> (i32, i32) {
    %c0_i32 = arith.constant 0 : i32
    %c0_i32_0 = arith.constant 0 : i32
    return %arg0, %c0_i32 : i32, i32
  }
  func.func @transform_1(%arg0: i32, %arg1: memref<1xi32, #tpu.memory_space<smem>>) -> (i32, i32) {
    %c0_i32 = arith.constant 0 : i32
    %c0_i32_0 = arith.constant 0 : i32
    return %arg0, %c0_i32 : i32, i32
  }
}

</mosaic_0001>

<bundles_post_ra>
// kernel: _dropout_apply.1
= control target key start
LH: loop header
LB: loop body
LE: loop exit
PB: predicated region body
PF: predicated region fallthrough
CT: control target
= control target key end

     0   :  { %v10_v0 = vlaneseq  ;;  %v137_v40 = vmov 1966171168   ;;  %s173_s0 = inlined_call_operand.<no memory space> [shape: s32[1], index: 0, kind: input, shape index: {}]   ;;  %s174_s1 = inlined_call_operand.vmem [shape: f32[1,512], index: 1, kind: input, shape index: {}]   ;;  %s175_s2 = inlined_call_operand.vmem [shape: f32[1,512], index: 2, kind: output, shape index: {}]  }
   0x1   :  { %s25_s11 = smul.u32 2654435769, %s173_s0  ;;  %v71_v32 = vld [vmem:[%s174_s1] sm:$0xf]  ;;  %v105_v41 = vunpack.c.l.s4 %v137_v40 }
   0x2   :  { %v157_v1 = vshrl.u32 %v10_v0, 7  ;;  %v13_v2 = vand.u32 127, %v10_v0  ;;  %v72_v39 = vmul.f32 1.1111112, %v71_v32  ;;  %vm129_vm4 = vcmp.lt.s32.totalorder %v10_v0, 512 }
   0x3   :  { %v26_v7 = vstv %s25_s11  ;;  %v106_v54 = vunpack.c.0.s8 %v105_v41 }
   0x4   :  { %v14_v3 = vadd.s32 128, %v13_v2  ;;  %v15_v4 = vadd.s32 256, %v13_v2  ;;  %v16_v5 = vadd.s32 384, %v13_v2  ;;  %v19_v6 = vmul.u32 512, %v157_v1 }
   0x5   :  { %v76_v44 = vsub.s32 0, %v157_v1  ;;  %v80_v45 = vsub.s32 1, %v157_v1  ;;  %v84_v48 = vsub.s32 2, %v157_v1  ;;  %v88_v49 = vsub.s32 3, %v157_v1 }
   0x6   :  { %v20_v8 = vadd.s32 %v19_v6, %v13_v2  ;;  %v21_v9 = vadd.s32 %v19_v6, %v14_v3  ;;  %v22_v10 = vadd.s32 %v19_v6, %v15_v4  ;;  %v23_v11 = vadd.s32 %v19_v6, %v16_v5 }
   0x7   :  { %v77_v57 = vrot.slane %v72_v39, %v76_v44  ;;  %v81_v58 = vrot.slane %v72_v39, %v80_v45  ;;  %v85_v61 = vrot.slane %v72_v39, %v84_v48  ;;  %v89_v62 = vrot.slane %v72_v39, %v88_v49 }
   0x8   :  { %v27_v12 = vxor.u32 %v26_v7, %v20_v8  ;;  %v28_v13 = vxor.u32 %v26_v7, %v21_v9  ;;  %v29_v14 = vxor.u32 %v26_v7, %v22_v10  ;;  %v30_v15 = vxor.u32 %v26_v7, %v23_v11 }
   0x9   :  { %v109_v3 = vsub.s32 %v106_v54, %v157_v1 }
   0xa   :  { %v31_v16 = vshrl.u32 %v27_v12, 16  ;;  %v32_v17 = vshrl.u32 %v28_v13, 16  ;;  %v33_v18 = vshrl.u32 %v29_v14, 16  ;;  %v34_v19 = vshrl.u32 %v30_v15, 16 }
   0xc   :  { %v35_v20 = vxor.u32 %v31_v16, %v27_v12  ;;  %v36_v21 = vxor.u32 %v32_v17, %v28_v13  ;;  %v37_v22 = vxor.u32 %v33_v18, %v29_v14  ;;  %v38_v23 = vxor.u32 %v34_v19, %v30_v15 }
   0xe   :  { %v39_v24 = vmul.u32 2146121005, %v35_v20  ;;  %v40_v25 = vmul.u32 2146121005, %v36_v21 }
   0xf   :  { %v41_v26 = vmul.u32 2146121005, %v37_v22  ;;  %v42_v27 = vmul.u32 2146121005, %v38_v23 }
  0x10   :  { %v43_v28 = vshrl.u32 %v39_v24, 15  ;;  %v44_v29 = vshrl.u32 %v40_v25, 15 }
  0x11   :  { %v45_v30 = vshrl.u32 %v41_v26, 15  ;;  %v46_v31 = vshrl.u32 %v42_v27, 15 }
  0x12   :  { %v47_v33 = vxor.u32 %v43_v28, %v39_v24  ;;  %v48_v34 = vxor.u32 %v44_v29, %v40_v25 }
  0x13   :  { %v49_v35 = vxor.u32 %v45_v30, %v41_v26  ;;  %v50_v36 = vxor.u32 %v46_v31, %v42_v27 }
  0x14   :  { %v51_v37 = vmul.u32 2221713035, %v47_v33  ;;  %v52_v38 = vmul.u32 2221713035, %v48_v34 }
  0x15   :  { %v53_v42 = vmul.u32 2221713035, %v49_v35  ;;  %v54_v43 = vmul.u32 2221713035, %v50_v36 }
  0x16   :  { %v55_v46 = vshrl.u32 %v51_v37, 16  ;;  %v56_v47 = vshrl.u32 %v52_v38, 16 }
  0x17   :  { %v57_v50 = vshrl.u32 %v53_v42, 16  ;;  %v58_v51 = vshrl.u32 %v54_v43, 16 }
  0x18   :  { %v59_v52 = vxor.u32 %v55_v46, %v51_v37  ;;  %v60_v53 = vxor.u32 %v56_v47, %v52_v38 }
  0x19   :  { %v61_v55 = vxor.u32 %v57_v50, %v53_v42  ;;  %v62_v56 = vxor.u32 %v58_v51, %v54_v43 }
  0x1a   :  { %v63_v59 = vshrl.u32 %v59_v52, 8  ;;  %v64_v60 = vshrl.u32 %v60_v53, 8 }
  0x1b   :  { %v65_v63 = vshrl.u32 %v61_v55, 8  ;;  %v66_v2 = vshrl.u32 %v62_v56, 8 }
  0x1c   :  { %vm67_vm0 = vcmp.ge.s32.totalorder %v63_v59, 1677722  ;;  %vm68_vm1 = vcmp.ge.s32.totalorder %v64_v60, 1677722 }
  0x1d   :  { %vm69_vm2 = vcmp.ge.s32.totalorder %v65_v63, 1677722  ;;  %vm70_vm3 = vcmp.ge.s32.totalorder %v66_v2, 1677722  ;;  %v94_v4 = vsel %vm67_vm0, %v77_v57, 0.0  ;;  %v95_v5 = vsel %vm68_vm1, %v81_v58, 0.0 }
  0x1e   :  { %v96_v6 = vsel %vm69_vm2, %v85_v61, 0.0  ;;  %v97_v7 = vsel %vm70_vm3, %v89_v62, 0.0  ;;  %v102_v8 = vcombine.low %v94_v4, %v95_v5 }
  0x1f   :  { %v103_v9 = vcombine.low %v96_v6, %v97_v7 }
  0x20   :  { %v110_v10 = vrot.slane %v102_v8, %v109_v3 }
  0x21   :  { %v117_v11 = vrot.slane %v103_v9, %v109_v3 }
  0x23   :  { %v118_v12 = vcombine.low %v110_v10, %v117_v11 }
  0x25   :  { %v125_v13 = vrot.slane %v118_v12, %v109_v3 }
  0x27   :  { %131 = vst.msk [vmem:[%s175_s2] sm:$0xf] %vm129_vm4, %v125_v13 }

</bundles_post_ra>
